<compile_context>
chip_gen: v7x
topology: tpu7x:2x2x1
jax: 0.10.0
libtpu: 0.0.40
codegen_flags: <defaults>
</compile_context>

<pallas_src>
import jax
import jax.numpy as jnp
from jax.experimental import pallas as pl
from jax.experimental.pallas import tpu as pltpu


# ---------------------------------------------------------------------------
# Kernel 1: streaming global avg + max pooling over the flattened spatial axis
# ---------------------------------------------------------------------------
def _make_pool_kernel(hw_total, t_hw, lanes, n_chunks):
    """Kernel closing over static sizes. Blocks: x (TB, Ct, t_hw) -> out (TB, 2, Ct)."""
    needs_mask = (hw_total % t_hw) != 0
    inv_hw = 1.0 / float(hw_total)

    def kernel(x_ref, o_ref, sum_ref, max_ref):
        hw = pl.program_id(2)
        last = pl.num_programs(2) - 1

        @pl.when(hw == 0)
        def _init():
            sum_ref[...] = jnp.zeros_like(sum_ref)
            max_ref[...] = jnp.full_like(max_ref, -jnp.inf)

        def accumulate(masked):
            # Lane-dense accumulation: elementwise add/max of 128-lane chunks
            # into (TB, Ct, lanes) f32 scratch -- pure VPU work per tile.
            s = sum_ref[...]
            m = max_ref[...]
            for j in range(n_chunks):
                chunk = x_ref[:, :, j * lanes:(j + 1) * lanes].astype(jnp.float32)
                if masked:
                    lane = jax.lax.broadcasted_iota(jnp.int32, chunk.shape, 2)
                    valid = (hw * t_hw + j * lanes + lane) < hw_total
                    s = s + jnp.where(valid, chunk, 0.0)
                    m = jnp.maximum(m, jnp.where(valid, chunk, -jnp.inf))
                else:
                    s = s + chunk
                    m = jnp.maximum(m, chunk)
            sum_ref[...] = s
            max_ref[...] = m

        if needs_mask:
            # Only the final spatial tile is ragged: mask only there.
            @pl.when(hw != last)
            def _fast():
                accumulate(False)

            @pl.when(hw == last)
            def _edge():
                accumulate(True)
        else:
            accumulate(False)

        @pl.when(hw == last)
        def _finalize():
            # Single cross-lane reduction of the lane-dense accumulators.
            avg = jnp.sum(sum_ref[...], axis=-1) * inv_hw      # (TB, Ct) f32
            mx = jnp.max(max_ref[...], axis=-1)                # (TB, Ct) f32
            o_ref[:, 0, :] = avg.astype(o_ref.dtype)
            o_ref[:, 1, :] = mx.astype(o_ref.dtype)

    return kernel


# ---------------------------------------------------------------------------
# Kernel 2: shared MLP (fc1 -> ReLU -> fc2) on both pooled branches + sigmoid
# ---------------------------------------------------------------------------
def _mlp_kernel(p_ref, w1_ref, w2_ref, o_ref):
    # p_ref : (2B, C) f32 -- rows [avg(b=0..B-1); max(b=0..B-1)]
    # w1_ref: (hidden, C), w2_ref: (C, hidden)   (Conv2d 1x1, bias=False)
    # o_ref : (B, C) in the input dtype
    p = p_ref[...].astype(jnp.float32)
    w1 = w1_ref[...].astype(jnp.float32)
    w2 = w2_ref[...].astype(jnp.float32)
    # p @ w1.T  (contract dim 1 of both operands -> no in-kernel transpose)
    h = jax.lax.dot_general(p, w1, (((1,), (1,)), ((), ())),
                            preferred_element_type=jnp.float32)
    h = jnp.maximum(h, 0.0)
    # h @ w2.T
    y = jax.lax.dot_general(h, w2, (((1,), (1,)), ((), ())),
                            preferred_element_type=jnp.float32)
    nb = o_ref.shape[0]
    att = jax.nn.sigmoid(y[:nb, :] + y[nb:, :])
    o_ref[...] = att.astype(o_ref.dtype)


# ---------------------------------------------------------------------------
# Wrapper
# ---------------------------------------------------------------------------
def _vmem_capacity_bytes():
    try:
        info = pltpu.get_tpu_info()
        for attr in ("vmem_capacity_bytes", "vmem_size_bytes"):
            cap = getattr(info, attr, None)
            if cap:
                return int(cap)
    except Exception:
        pass
    return 64 * 1024 * 1024  # conservative default (v7x per-core VMEM)


def channel_attention(x, w1, w2, *, t_b=None, t_c=None, t_hw=None,
                      tile_bytes_target=None):
    """x: (B, C, H, W); w1: (C//r, C); w2: (C, C//r). Returns (B, C, 1, 1)."""
    B, C, H, W = x.shape
    HW = H * W
    hidden = w1.shape[0]
    itemsize = jnp.dtype(x.dtype).itemsize

    x_flat = x.reshape(B, C, HW)  # free reshape; NCHW keeps spatial contiguous

    # Generation-aware budgets: ~cap/16 per streaming block (8 MiB on 128 MiB
    # VMEM chips, 4 MiB on 64 MiB v7x).
    vmem_cap = _vmem_capacity_bytes()
    if tile_bytes_target is None:
        tile_bytes_target = max(2 * 1024 * 1024, vmem_cap // 16)

    # --- batch tile: amortize per-grid-step overhead when C*HW is small ---
    if t_b is None:
        bytes_per_row = max(C * HW * itemsize, 1)
        t_b = int(min(B, max(1, tile_bytes_target // bytes_per_row)))
    t_b = int(max(1, min(t_b, B)))

    # --- channel tile: only to enable megacore splitting when the batch grid
    #     would collapse to a single step (needs t_c % 128 == 0 for the
    #     lane-dense output block) ---
    if t_c is None:
        t_c = C
        if pl.cdiv(B, t_b) == 1 and C % 256 == 0:
            t_c = C // 2
    assert t_c == C or (C % t_c == 0 and t_c % 128 == 0), "bad channel tile"

    # --- spatial tile: multiple of 128 (or full HW when HW < 128) ---
    if t_hw is None:
        if HW <= 128:
            t_hw = HW
        else:
            max_chunks = HW // 128
            per_chunk = t_b * t_c * 128 * itemsize
            want = max(1, int(tile_bytes_target // per_chunk))
            t_hw = 128 * min(max_chunks, want)
    assert t_hw == HW or t_hw % 128 == 0, "spatial tile must be full or 128-aligned"

    lanes = 128 if t_hw % 128 == 0 else t_hw
    n_chunks = t_hw // lanes

    grid = (pl.cdiv(B, t_b), pl.cdiv(C, t_c), pl.cdiv(HW, t_hw))

    # VMEM limit derived from the chosen working set (double-buffered input +
    # f32 accumulators + output block), clamped to the physical capacity.
    in_block = t_b * t_c * t_hw * itemsize
    scratch_bytes = 2 * t_b * t_c * lanes * 4
    out_block = t_b * 2 * t_c * 4
    working = 2 * in_block + scratch_bytes + 2 * out_block
    vmem_limit = max(working + (4 << 20), 32 << 20)
    vmem_limit = int(min(vmem_limit, int(0.9 * vmem_cap)))
    vmem_limit = int(max(vmem_limit, working + (1 << 20)))

    pool_kernel = _make_pool_kernel(HW, t_hw, lanes, n_chunks)

    cost = pl.CostEstimate(
        flops=2 * B * C * HW,                      # streaming sum + max
        transcendentals=0,
        bytes_accessed=x_flat.size * itemsize + B * 2 * C * 4,
    )

    pooled = pl.pallas_call(
        pool_kernel,
        out_shape=jax.ShapeDtypeStruct((B, 2, C), jnp.float32),
        grid=grid,
        in_specs=[
            pl.BlockSpec((t_b, t_c, t_hw), lambda b, c, h: (b, c, h)),
        ],
        out_specs=pl.BlockSpec((t_b, 2, t_c), lambda b, c, h: (b, 0, c)),
        scratch_shapes=[
            pltpu.VMEM((t_b, t_c, lanes), jnp.float32),  # running sum (lane-dense)
            pltpu.VMEM((t_b, t_c, lanes), jnp.float32),  # running max (lane-dense)
        ],
        compiler_params=pltpu.CompilerParams(
            dimension_semantics=("parallel", "parallel", "arbitrary"),
            vmem_limit_bytes=vmem_limit,
        ),
        cost_estimate=cost,
    )(x_flat)

    # Stack avg rows then max rows -> (2B, C); one batched GEMM pair for the
    # shared MLP over all batch rows and both branches.
    p = pooled.transpose(1, 0, 2).reshape(2 * B, C)

    att = pl.pallas_call(
        _mlp_kernel,
        out_shape=jax.ShapeDtypeStruct((B, C), x.dtype),
    )(p, w1, w2)

    return att.reshape(B, C, 1, 1)


# ---------------------------------------------------------------------------
# Pure-JAX reference matching the PyTorch forward exactly
# ---------------------------------------------------------------------------
def reference_channel_attention(x, w1, w2):
    avg = jnp.mean(x, axis=(2, 3))   # (B, C)
    mx = jnp.max(x, axis=(2, 3))     # (B, C)

    def branch(v):
        h = jnp.maximum(v @ w1.T, 0.0)
        return h @ w2.T

    out = jax.nn.sigmoid(branch(avg) + branch(mx))
    return out[:, :, None, None]


def _run_case(key, B, C, H, W, ratio, **kw):
    hidden = C // ratio
    kx, k1, k2 = jax.random.split(key, 3)
    x = jax.random.normal(kx, (B, C, H, W), dtype=jnp.float32)
    w1 = jax.random.normal(k1, (hidden, C), dtype=jnp.float32) * 0.1
    w2 = jax.random.normal(k2, (C, hidden), dtype=jnp.float32) * 0.1

    out = jax.block_until_ready(channel_attention(x, w1, w2, **kw))
    ref = reference_channel_attention(x, w1, w2)
    assert out.shape == (B, C, 1, 1)
    assert jnp.allclose(out, ref, atol=1e-5, rtol=1e-5), "mismatch vs reference"


if __name__ == "__main__":
    key = jax.random.PRNGKey(0)
    k1, k2 = jax.random.split(key)

    # Case 1: small map, single spatial tile, batch-tiled block (TB = B).
    _run_case(k1, B=2, C=16, H=16, W=16, ratio=8)

    # Case 2: multi-tile spatial axis with a ragged last tile (masking only on
    # the final tile, cross-step accumulation), forced t_hw=128, TB=1.
    _run_case(k2, B=2, C=32, H=18, W=18, ratio=8, t_b=1, t_hw=128)

    print("KERNEL_OK")
</pallas_src>

<mosaic_0001>
module attributes {stable_mosaic.version = 11 : i64} {
  func.func @kernel(%arg0: i32, %arg1: i32, %arg2: i32, %arg3: memref<2x16x256xf32, #tpu.memory_space<vmem>>, %arg4: memref<2x2x16xf32, #tpu.memory_space<vmem>>, %arg5: memref<2x16x128xf32, #tpu.memory_space<vmem>>, %arg6: memref<2x16x128xf32, #tpu.memory_space<vmem>>) attributes {dimension_semantics = [#tpu.dimension_semantics<parallel>, #tpu.dimension_semantics<parallel>, #tpu.dimension_semantics<arbitrary>], iteration_bounds = array<i64: 1, 1, 1>, scalar_prefetch = 0 : i64, scratch_operands = 2 : i64, tpu.core_type = #tpu.core_type<tc>, window_params = [{transform_indices = @transform_0, window_bounds = array<i64: 2, 16, 256>}, {transform_indices = @transform_1, window_bounds = array<i64: 2, 2, 16>}]} {
    %c0_i32 = arith.constant 0 : i32
    %0 = arith.cmpi eq, %arg2, %c0_i32 : i32
    %1 = arith.extui %0 : i1 to i32
    %c0_i32_0 = arith.constant 0 : i32
    %2 = arith.cmpi ne, %1, %c0_i32_0 : i32
    scf.if %2 {
      %cst = arith.constant 0.000000e+00 : f32
      %16 = vector.broadcast %cst : f32 to vector<2x16x128xf32>
      %c0_19 = arith.constant 0 : index
      %c0_20 = arith.constant 0 : index
      %c0_21 = arith.constant 0 : index
      %17 = vector.load %arg5[%c0_19, %c0_20, %c0_21] : memref<2x16x128xf32, #tpu.memory_space<vmem>>, vector<2x16x128xf32>
      tpu.vector_store %arg5[%c0_19, %c0_20, %c0_21], %16 {strides = array<i32>} : memref<2x16x128xf32, #tpu.memory_space<vmem>>, vector<2x16x128xf32>,
      %cst_22 = arith.constant 0xFF800000 : f32
      %18 = vector.broadcast %cst_22 : f32 to vector<2x16x128xf32>
      %c0_23 = arith.constant 0 : index
      %c0_24 = arith.constant 0 : index
      %c0_25 = arith.constant 0 : index
      %19 = vector.load %arg6[%c0_23, %c0_24, %c0_25] : memref<2x16x128xf32, #tpu.memory_space<vmem>>, vector<2x16x128xf32>
      tpu.vector_store %arg6[%c0_23, %c0_24, %c0_25], %18 {strides = array<i32>} : memref<2x16x128xf32, #tpu.memory_space<vmem>>, vector<2x16x128xf32>,
    } else {
    }
    %c0 = arith.constant 0 : index
    %c0_1 = arith.constant 0 : index
    %c0_2 = arith.constant 0 : index
    %3 = vector.load %arg5[%c0, %c0_1, %c0_2] : memref<2x16x128xf32, #tpu.memory_space<vmem>>, vector<2x16x128xf32>
    %c0_3 = arith.constant 0 : index
    %c0_4 = arith.constant 0 : index
    %c0_5 = arith.constant 0 : index
    %4 = vector.load %arg6[%c0_3, %c0_4, %c0_5] : memref<2x16x128xf32, #tpu.memory_space<vmem>>, vector<2x16x128xf32>
    %c0_6 = arith.constant 0 : index
    %c0_7 = arith.constant 0 : index
    %c0_8 = arith.constant 0 : index
    %5 = vector.load %arg3[%c0_6, %c0_7, %c0_8] : memref<2x16x256xf32, #tpu.memory_space<vmem>>, vector<2x16x128xf32>
    %6 = arith.addf %3, %5 : vector<2x16x128xf32>
    %7 = arith.maximumf %4, %5 : vector<2x16x128xf32>
    %c0_9 = arith.constant 0 : index
    %c0_10 = arith.constant 0 : index
    %c128 = arith.constant 128 : index
    %8 = vector.load %arg3[%c0_9, %c0_10, %c128] : memref<2x16x256xf32, #tpu.memory_space<vmem>>, vector<2x16x128xf32>
    %9 = arith.addf %6, %8 : vector<2x16x128xf32>
    %10 = arith.maximumf %7, %8 : vector<2x16x128xf32>
    %c0_11 = arith.constant 0 : index
    %c0_12 = arith.constant 0 : index
    %c0_13 = arith.constant 0 : index
    %11 = vector.load %arg5[%c0_11, %c0_12, %c0_13] : memref<2x16x128xf32, #tpu.memory_space<vmem>>, vector<2x16x128xf32>
    tpu.vector_store %arg5[%c0_11, %c0_12, %c0_13], %9 {strides = array<i32>} : memref<2x16x128xf32, #tpu.memory_space<vmem>>, vector<2x16x128xf32>,
    %c0_14 = arith.constant 0 : index
    %c0_15 = arith.constant 0 : index
    %c0_16 = arith.constant 0 : index
    %12 = vector.load %arg6[%c0_14, %c0_15, %c0_16] : memref<2x16x128xf32, #tpu.memory_space<vmem>>, vector<2x16x128xf32>
    tpu.vector_store %arg6[%c0_14, %c0_15, %c0_16], %10 {strides = array<i32>} : memref<2x16x128xf32, #tpu.memory_space<vmem>>, vector<2x16x128xf32>,
    %c0_i32_17 = arith.constant 0 : i32
    %13 = arith.cmpi eq, %arg2, %c0_i32_17 : i32
    %14 = arith.extui %13 : i1 to i32
    %c0_i32_18 = arith.constant 0 : i32
    %15 = arith.cmpi ne, %14, %c0_i32_18 : i32
    scf.if %15 {
      %c0_19 = arith.constant 0 : index
      %c0_20 = arith.constant 0 : index
      %c0_21 = arith.constant 0 : index
      %16 = vector.load %arg5[%c0_19, %c0_20, %c0_21] : memref<2x16x128xf32, #tpu.memory_space<vmem>>, vector<2x16x128xf32>
      %cst = arith.constant dense<0.000000e+00> : vector<2x16xf32>
      %17 = vector.multi_reduction <add>, %16, %cst [2] : vector<2x16x128xf32> to vector<2x16xf32>
      %cst_22 = arith.constant 3.906250e-03 : f32
      %18 = vector.broadcast %cst_22 : f32 to vector<2x16xf32>
      %19 = arith.mulf %17, %18 : vector<2x16xf32>
      %c0_23 = arith.constant 0 : index
      %c0_24 = arith.constant 0 : index
      %c0_25 = arith.constant 0 : index
      %20 = vector.load %arg6[%c0_23, %c0_24, %c0_25] : memref<2x16x128xf32, #tpu.memory_space<vmem>>, vector<2x16x128xf32>
      %cst_26 = arith.constant dense<0xFF800000> : vector<2x16xf32>
      %21 = vector.multi_reduction <maximumf>, %20, %cst_26 [2] : vector<2x16x128xf32> to vector<2x16xf32>
      %c0_27 = arith.constant 0 : index
      %c0_28 = arith.constant 0 : index
      %c0_29 = arith.constant 0 : index
      %22 = vector.load %arg4[%c0_27, %c0_28, %c0_29] : memref<2x2x16xf32, #tpu.memory_space<vmem>>, vector<2x1x16xf32>
      %23 = vector.shape_cast %22 : vector<2x1x16xf32> to vector<2x16xf32>
      %24 = vector.shape_cast %19 : vector<2x16xf32> to vector<2x1x16xf32>
      tpu.vector_store %arg4[%c0_27, %c0_28, %c0_29], %24 {strides = array<i32>} : memref<2x2x16xf32, #tpu.memory_space<vmem>>, vector<2x1x16xf32>,
      %c0_30 = arith.constant 0 : index
      %c1 = arith.constant 1 : index
      %c0_31 = arith.constant 0 : index
      %25 = vector.load %arg4[%c0_30, %c1, %c0_31] : memref<2x2x16xf32, #tpu.memory_space<vmem>>, vector<2x1x16xf32>
      %26 = vector.shape_cast %25 : vector<2x1x16xf32> to vector<2x16xf32>
      %27 = vector.shape_cast %21 : vector<2x16xf32> to vector<2x1x16xf32>
      tpu.vector_store %arg4[%c0_30, %c1, %c0_31], %27 {strides = array<i32>} : memref<2x2x16xf32, #tpu.memory_space<vmem>>, vector<2x1x16xf32>,
    } else {
    }
    return
  }
  func.func @transform_0(%arg0: i32, %arg1: i32, %arg2: i32) -> (i32, i32, i32) {
    %c0_i32 = arith.constant 0 : i32
    return %arg0, %arg1, %arg2 : i32, i32, i32
  }
  func.func @transform_1(%arg0: i32, %arg1: i32, %arg2: i32) -> (i32, i32, i32) {
    %c0_i32 = arith.constant 0 : i32
    %c0_i32_0 = arith.constant 0 : i32
    return %arg0, %c0_i32, %arg1 : i32, i32, i32
  }
}

</mosaic_0001>

<bundles_post_ra>
// kernel: tpu_custom_call.1
= control target key start
LH: loop header
LB: loop body
LE: loop exit
PB: predicated region body
PF: predicated region fallthrough
CT: control target
= control target key end

     0   :  { %6 = vsyncpa [#allocation5], 0  ;;  %s282_s0 = inlined_call_operand.hbm [shape: f32[2,16,256], index: 0, kind: input, shape index: {}]   ;;  %s283_s1 = inlined_call_operand.hbm [shape: f32[2,2,16], index: 1, kind: output, shape index: {}]  }
   0x1   :  { %7 = vsyncpa [#allocation6], 0  ;;  %s234_s6 = smov [#allocation4]   ;;  %s186_s10 = scalar_lea.hbm %s282_s0, 1024 }
   0x2   :  { %s13_s7 = sshll.u32 %s234_s6, 4  ;;  %p187_p0 = scmp.ne.s32.totalorder %s282_s0, %s186_s10  ;;  %s14_s7 = int_to_ptr.vmem [resolvable:$true] %s13_s7 }
   0x3   :  { %p190_p1 = scmp.lt.u32.totalorder %s186_s10, %s282_s0 }
   0x5   :  { %p192_p2 = pnand %p190_p1, %p187_p0 }
   0x7   :  { %195 = shalt.err (!%p192_p2)
}
   0x8   :  { %s196_s15 = scalar_lea.vmem %s14_s7, 1024  ;;  %p201_p4 = scmp.lt.s32.totalorder %s14_s7, %s14_s7 }
   0x9   :  { %p197_p3 = scmp.ne.s32.totalorder %s14_s7, %s196_s15  ;;  %p202_p5 = scmp.lt.s32.totalorder %s196_s15, %s196_s15 }
   0xb   :  { %p203_p6 = por %p202_p5, %p201_p4 }
   0xd   :  { %p204_p7 = pnand %p203_p6, %p197_p3 }
   0xf   :  { %207 = shalt.err (!%p204_p7)
}
  0x10   :  { %s235_s16 = smov 256   ;;  %s236_s17 = smov 16  }
  0x11   :  { %19 = dma.hbm_to_vmem [thread:$0]  %s282_s0, 1024, %s14_s7, [#allocation5], %s235_s16, %s235_s16, %s236_s17  }
  0x12   :  { %230 = dma.done.wait [#allocation5], 1024  }
  0x13   :  { %231 = vsyncadd [#allocation5], 4294966272  ;;  %v45_v0 = vld [vmem:[#allocation4 + $0x20] sm:$0xff]  ;;  %v57_v1 = vld [vmem:[#allocation4 + $0x28] sm:$0xff]  ;;  %v110_v16 = vlaneseq  ;;  %vm121_vm0 = vcmask 130112   ;;  %vm134_vm1 = vcmask 122880  }
  0x14   :  { %v43_v2 = vld [vmem:[#allocation4] sm:$0xff]  ;;  %v61_v3 = vadd.f32 %v57_v1, %v45_v0  ;;  %v55_v4 = vld [vmem:[#allocation4 + $0x8] sm:$0xff]  ;;  %v46_v5 = vld [vmem:[#allocation4 + $0x30] sm:$0xff]  ;;  %v65_v15 = vmax.f32 %v45_v0, %v57_v1  ;;  %s237_s0 = smov [#allocation7]  }
  0x15   :  { %v58_v6 = vld [vmem:[#allocation4 + $0x38] sm:$0xff]  ;;  %v59_v7 = vadd.f32 %v55_v4, %v43_v2  ;;  %v44_v8 = vld [vmem:[#allocation4 + $0x10] sm:$0xff]  ;;  %v63_v13 = vmax.f32 %v43_v2, %v55_v4  ;;  %v111_v17 = vand.u32 127, %v110_v16  ;;  %v113_v18 = vshrl.u32 %v110_v16, 7  ;;  %s168_s20 = sshll.u32 %s237_s0, 4  ;;  %s169_s20 = int_to_ptr.vmem [resolvable:$true] %s168_s20 }
  0x16   :  { %v56_v9 = vld [vmem:[#allocation4 + $0x18] sm:$0xff]  ;;  %86 = vadd.xlane.f32.xlu1 %v61_v3  ;;  %v62_v10 = vadd.f32 %v58_v6, %v46_v5  ;;  %v66_v14 = vmax.f32 %v46_v5, %v58_v6  ;;  %s208_s21 = scalar_lea.vmem %s169_s20, 64  ;;  %p213_p9 = scmp.lt.s32.totalorder %s169_s20, %s169_s20 }
  0x17   :  { %82 = vadd.xlane.f32.xlu0 %v59_v7  ;;  %v60_v11 = vadd.f32 %v56_v9, %v44_v8  ;;  %v64_v12 = vmax.f32 %v44_v8, %v56_v9  ;;  %v116_v19 = vadd.s32 4294967288, %v111_v17  ;;  %v114_v22 = vsub.s32 %v111_v17, %v113_v18  ;;  %p209_p8 = scmp.ne.s32.totalorder %s169_s20, %s208_s21  ;;  %p214_p10 = scmp.lt.s32.totalorder %s208_s21, %s208_s21 }
  0x19   :  { %v119_v24 = vsub.s32 %v116_v19, %v113_v18  ;;  %p215_p11 = por %p214_p10, %p213_p9 }
  0x1a   :  { %88 = vadd.xlane.f32.xlu1 %v62_v10 }
  0x1b   :  { %84 = vadd.xlane.f32.xlu0 %v60_v11  ;;  %p216_p12 = pnand %p215_p11, %p209_p8 }
  0x1e   :  { %100 = vmax.xlane.f32.xlu1 %v64_v12 }
  0x1f   :  { %98 = vmax.xlane.f32.xlu0 %v63_v13 }
  0x22   :  { %104 = vmax.xlane.f32.xlu1 %v66_v14 }
  0x23   :  { %102 = vmax.xlane.f32.xlu0 %v65_v15 }
  0xa3   :  { %v87_v20 = vpop.xlane.xlu1 %86 }
  0xa4   :  { %v83_v21 = vpop.xlane.xlu0 %82  ;;  %v92_v23 = vmul.f32 0.00390625, %v87_v20 }
  0xa5   :  { %v90_v25 = vmul.f32 0.00390625, %v83_v21 }
  0xa6   :  { %v126_v30 = vrot.slane %v92_v23, %v114_v22 }
  0xa7   :  { %v89_v26 = vpop.xlane.xlu1 %88  ;;  %v115_v32 = vrot.slane %v90_v25, %v114_v22 }
  0xa8   :  { %v93_v27 = vmul.f32 0.00390625, %v89_v26  ;;  %v85_v28 = vpop.xlane.xlu0 %84 }
  0xa9   :  { %v91_v29 = vmul.f32 0.00390625, %v85_v28 }
  0xaa   :  { %v130_v31 = vrot.slane %v93_v27, %v119_v24 }
  0xab   :  { %v120_v33 = vrot.slane %v91_v29, %v119_v24  ;;  %v101_v34 = vpop.xlane.xlu1 %100 }
  0xac   :  { %v131_v35 = vsel %vm121_vm0, %v130_v31, %v126_v30  ;;  %v148_v36 = vrot.slane %v101_v34, %v119_v24  ;;  %v99_v37 = vpop.xlane.xlu0 %98 }
  0xad   :  { %136 = vst.msk [vmem:[#allocation7 + $0x2] sm:$0x1] %vm134_vm1, %v131_v35  ;;  %v122_v38 = vsel %vm121_vm0, %v120_v33, %v115_v32  ;;  %v144_v39 = vrot.slane %v99_v37, %v114_v22 }
  0xae   :  { %135 = vst.msk [vmem:[#allocation7] sm:$0x1] %vm134_vm1, %v122_v38 }
  0xaf   :  { %v149_v40 = vsel %vm121_vm0, %v148_v36, %v144_v39  ;;  %v105_v41 = vpop.xlane.xlu1 %104 }
  0xb0   :  { %161 = vst.msk [vmem:[#allocation7 + $0x1] sm:$0x1] %vm134_vm1, %v149_v40  ;;  %v157_v42 = vrot.slane %v105_v41, %v119_v24  ;;  %v103_v43 = vpop.xlane.xlu0 %102 }
  0xb1   :  { %v153_v44 = vrot.slane %v103_v43, %v114_v22 }
  0xb3   :  { %v158_v45 = vsel %vm121_vm0, %v157_v42, %v153_v44 }
  0xb4   :  { %162 = vst.msk [vmem:[#allocation7 + $0x3] sm:$0x1] %vm134_vm1, %v158_v45 }
  0xb5   :  { %219 = shalt.err (!%p216_p12)
}
  0xb6   :  { %s220_s24 = scalar_lea.hbm %s283_s1, 64 }
  0xb7   :  { %p221_p13 = scmp.ne.s32.totalorder %s283_s1, %s220_s24  ;;  %p224_p0 = scmp.lt.u32.totalorder %s220_s24, %s283_s1 }
  0xb9   :  { %p226_p1 = pnand %p224_p0, %p221_p13 }
  0xbb   :  { %229 = shalt.err (!%p226_p1)
}
  0xbc   :  { %s238_s29 = smov 32   ;;  %s239_s30 = smov 2  }
  0xbd   :  { %174 = dma.vmem_to_hbm [thread:$0]  %s169_s20, 64, %s283_s1, [#allocation6], %s238_s29, %s238_s29, %s239_s30  }
  0xbe   :  { %232 = dma.done.wait [#allocation6], 64  }
  0xbf   :  { %233 = vsyncadd [#allocation6], 4294967232 }
  0xc0   :  { %178 = vsyncpa [#allocation5], 1 }
  0xc1   :  { %179 = vsyncpa [#allocation6], 1 }

</bundles_post_ra>
